<compile_context>
chip_gen: v7x
topology: tpu7x:2x2x1
jax: 0.10.0
libtpu: 0.0.40
codegen_flags: <defaults>
</compile_context>

<pallas_src>
import math

import jax
import jax.numpy as jnp
import numpy as np
from jax.experimental import pallas as pl
from jax.experimental.pallas import tpu as pltpu


def _partial_cost_kernel(fdil_ref, fstd_ref, dil_ref, std_ref, out_ref):
    """One grid step = one (layer, row-tile): emit sum(d*f_dil + s*f_std)."""
    l = pl.program_id(0)
    # int8 -> f32 on the VPU, then a single fused weighted reduction
    # (one sublane reduce + one lane reduce instead of two full reductions).
    d = dil_ref[0].astype(jnp.float32)                    # (TR, 128)
    s = std_ref[0].astype(jnp.float32)                    # (TR, 128)
    w = d * fdil_ref[l] + s * fstd_ref[l]                 # (TR, 128)
    col = jnp.sum(w, axis=0, keepdims=True)               # (1, 128)
    out_ref[0, 0] = jnp.sum(col, axis=1, keepdims=True)   # (1, 1)


def sparsity_criterion(dil_masks, std_masks, flops_dil, flops_std,
                       sparsity_target, epoch, num_epochs,
                       total_positions=None):
    """Pallas implementation of SparsityCriterion.forward (returns scalar loss).

    dil_masks / std_masks: (L, R, 128) hard 0/1 masks (any integer/float dtype;
    shipped to the kernel as int8).
    """
    L, R, LANE = dil_masks.shape
    if total_positions is None:
        total_positions = R * LANE

    # Annealing schedule — identical scalar math to the torch module.
    p = epoch / (0.33 * num_epochs)
    progress = math.cos(min(max(p, 0.0), 1.0) * (math.pi / 2)) ** 2
    upper_bound = 1.0 - progress * (1.0 - sparsity_target)
    lower_bound = progress * sparsity_target

    flops_dil = jnp.asarray(flops_dil, jnp.float32)
    flops_std = jnp.asarray(flops_std, jnp.float32)

    # Data-independent totals + reciprocals precomputed on the host: no per-step
    # divide and no `total` accumulator in the kernel.
    t = float(total_positions) * (np.asarray(flops_dil, np.float64) +
                                  np.asarray(flops_std, np.float64))
    inv_t = jnp.asarray(1.0 / t, jnp.float32)             # (L,)
    inv_total = float(1.0 / t.sum())

    # Narrow the HBM dtype: 0/1 masks as int8, accumulate in f32 in-kernel.
    dil_masks = dil_masks.astype(jnp.int8)
    std_masks = std_masks.astype(jnp.int8)

    # Row-tile size: whole layer in one block when small; otherwise ~0.5 MiB
    # int8 blocks (multiple of the int8 (32,128) tiling), zero-padded rows
    # contribute nothing to the sums.
    TR_MAX = 4096
    if R <= TR_MAX:
        TR = R
    else:
        TR = TR_MAX
        pad = (-R) % TR
        if pad:
            dil_masks = jnp.pad(dil_masks, ((0, 0), (0, pad), (0, 0)))
            std_masks = jnp.pad(std_masks, ((0, 0), (0, pad), (0, 0)))
        R = R + pad
    T = R // TR

    partial = pl.pallas_call(
        _partial_cost_kernel,
        out_shape=jax.ShapeDtypeStruct((L, T, 1, 1), jnp.float32),
        grid_spec=pltpu.PrefetchScalarGridSpec(
            num_scalar_prefetch=0,
            grid=(L, T),
            in_specs=[
                pl.BlockSpec(memory_space=pltpu.MemorySpace.SMEM),  # flops_dil (L,)
                pl.BlockSpec(memory_space=pltpu.MemorySpace.SMEM),  # flops_std (L,)
                pl.BlockSpec((1, TR, LANE), lambda l, t: (l, t, 0)),
                pl.BlockSpec((1, TR, LANE), lambda l, t: (l, t, 0)),
            ],
            out_specs=pl.BlockSpec((1, 1, 1, 1), lambda l, t: (l, t, 0, 0)),
        ),
        compiler_params=pltpu.CompilerParams(
            dimension_semantics=("parallel", "parallel"),
            vmem_limit_bytes=32 * 1024 * 1024),
    )(flops_dil, flops_std, dil_masks, std_masks)

    # Tiny O(L) scalar epilogue in plain JAX (keeps the grid fully parallel).
    c = jnp.sum(partial.reshape(L, T), axis=1)            # per-layer cost (L,)
    layer_perc = c * inv_t
    loss_block = jnp.mean(
        jnp.maximum(layer_perc - upper_bound, 0.0) ** 2
        + jnp.maximum(lower_bound - layer_perc, 0.0) ** 2)
    perc = jnp.sum(c) * inv_total
    loss_network = (perc - sparsity_target) ** 2
    return loss_network + loss_block


def _reference(dil_masks, std_masks, flops_dil, flops_std,
               sparsity_target, epoch, num_epochs):
    """Pure numpy reference mirroring the torch forward (logger/asserts dropped)."""
    p = epoch / (0.33 * num_epochs)
    progress = math.cos(min(max(p, 0.0), 1.0) * (math.pi / 2)) ** 2
    upper_bound = 1.0 - progress * (1.0 - sparsity_target)
    lower_bound = progress * sparsity_target

    L = dil_masks.shape[0]
    total_positions = dil_masks.shape[1] * dil_masks.shape[2]
    loss_block, cost, total = 0.0, 0.0, 0.0
    for i in range(L):
        a_dil = float(dil_masks[i].astype(np.float64).sum())
        a_std = float(std_masks[i].astype(np.float64).sum())
        c = a_dil * float(flops_dil[i]) + a_std * float(flops_std[i])
        t = total_positions * float(flops_dil[i]) + total_positions * float(flops_std[i])
        layer_perc = c / t
        loss_block += max(0.0, layer_perc - upper_bound) ** 2
        loss_block += max(0.0, lower_bound - layer_perc) ** 2
        cost += c
        total += t
    perc = cost / total
    loss_block /= L
    loss_network = (perc - sparsity_target) ** 2
    return loss_network + loss_block


if __name__ == "__main__":
    # 3 sparsity blocks ("masks"); each mask has the PyTorch shape
    # [N, 1, H, W] = [2, 1, 16, 16] -> 512 positions per layer.
    L, N, H, W = 3, 2, 16, 16
    LANE = 128
    R = (N * 1 * H * W) // LANE

    key = jax.random.PRNGKey(0)
    k1, k2 = jax.random.split(key)
    dil_nchw = (jax.random.uniform(k1, (L, N, 1, H, W)) < 0.7)
    std_nchw = (jax.random.uniform(k2, (L, N, 1, H, W)) < 0.4)

    # Flatten NCHW (C==1) -> lane-dense (L, R, 128) int8 slabs.
    dil_masks = dil_nchw.reshape(L, R, LANE).astype(jnp.int8)
    std_masks = std_nchw.reshape(L, R, LANE).astype(jnp.int8)

    # Deterministic per-layer flops_per_position (e.g. 3x3 convs at C=64/128/256).
    flops_dil = jnp.asarray([9.0 * 64 * 64, 9.0 * 128 * 128, 9.0 * 256 * 256],
                            jnp.float32)
    flops_std = jnp.asarray([9.0 * 64 * 64, 9.0 * 128 * 128, 9.0 * 256 * 256],
                            jnp.float32)

    sparsity_target = 0.5
    epoch = 3
    num_epochs = 10

    loss = sparsity_criterion(dil_masks, std_masks, flops_dil, flops_std,
                              sparsity_target, epoch, num_epochs)
    loss = jax.block_until_ready(loss)

    ref = _reference(np.asarray(dil_masks), np.asarray(std_masks),
                     np.asarray(flops_dil), np.asarray(flops_std),
                     sparsity_target, epoch, num_epochs)

    # TODO(synk): logger.add(...) side effects and runtime asserts from the
    # torch module have no kernel equivalent and are intentionally dropped.
    assert abs(float(loss) - float(ref)) <= 1e-4 * max(1.0, abs(float(ref))), (
        float(loss), float(ref))
    print("KERNEL_OK")
</pallas_src>

<mosaic_0001>
module attributes {stable_mosaic.version = 11 : i64} {
  func.func @_partial_cost_kernel(%arg0: i32, %arg1: i32, %arg2: memref<3xf32, #tpu.memory_space<smem>>, %arg3: memref<3xf32, #tpu.memory_space<smem>>, %arg4: memref<1x4x128xi8, #tpu.memory_space<vmem>>, %arg5: memref<1x4x128xi8, #tpu.memory_space<vmem>>, %arg6: memref<1x1x1x1xf32, #tpu.memory_space<vmem>>) attributes {dimension_semantics = [#tpu.dimension_semantics<parallel>, #tpu.dimension_semantics<parallel>], iteration_bounds = array<i64: 3, 1>, scalar_prefetch = 0 : i64, scratch_operands = 0 : i64, tpu.core_type = #tpu.core_type<tc>, window_params = [{transform_indices = @transform_0, window_bounds = array<i64: 3>}, {transform_indices = @transform_1, window_bounds = array<i64: 3>}, {transform_indices = @transform_2, window_bounds = array<i64: 1, 4, 128>}, {transform_indices = @transform_3, window_bounds = array<i64: 1, 4, 128>}, {transform_indices = @transform_4, window_bounds = array<i64: 1, 1, 1, 1>}]} {
    %c0 = arith.constant 0 : index
    %c0_0 = arith.constant 0 : index
    %c0_1 = arith.constant 0 : index
    %0 = vector.load %arg4[%c0, %c0_0, %c0_1] : memref<1x4x128xi8, #tpu.memory_space<vmem>>, vector<1x4x128xi8>
    %1 = vector.shape_cast %0 : vector<1x4x128xi8> to vector<4x128xi8>
    %2 = arith.sitofp %1 : vector<4x128xi8> to vector<4x128xf32>
    %c0_2 = arith.constant 0 : index
    %c0_3 = arith.constant 0 : index
    %c0_4 = arith.constant 0 : index
    %3 = vector.load %arg5[%c0_2, %c0_3, %c0_4] : memref<1x4x128xi8, #tpu.memory_space<vmem>>, vector<1x4x128xi8>
    %4 = vector.shape_cast %3 : vector<1x4x128xi8> to vector<4x128xi8>
    %5 = arith.sitofp %4 : vector<4x128xi8> to vector<4x128xf32>
    %6 = arith.index_cast %arg0 : i32 to index
    %7 = memref.load %arg2[%6] : memref<3xf32, #tpu.memory_space<smem>>
    %8 = vector.broadcast %7 : f32 to vector<4x128xf32>
    %9 = arith.mulf %2, %8 : vector<4x128xf32>
    %10 = arith.index_cast %arg0 : i32 to index
    %11 = memref.load %arg3[%10] : memref<3xf32, #tpu.memory_space<smem>>
    %12 = vector.broadcast %11 : f32 to vector<4x128xf32>
    %13 = arith.mulf %5, %12 : vector<4x128xf32>
    %14 = arith.addf %9, %13 : vector<4x128xf32>
    %cst = arith.constant dense<0.000000e+00> : vector<128xf32>
    %15 = vector.multi_reduction <add>, %14, %cst [0] : vector<4x128xf32> to vector<128xf32>
    %16 = vector.shape_cast %15 : vector<128xf32> to vector<1x128xf32>
    %cst_5 = arith.constant dense<0.000000e+00> : vector<1xf32>
    %17 = vector.multi_reduction <add>, %16, %cst_5 [1] : vector<1x128xf32> to vector<1xf32>
    %18 = vector.shape_cast %17 : vector<1xf32> to vector<1x1xf32>
    %c0_6 = arith.constant 0 : index
    %c0_7 = arith.constant 0 : index
    %c0_8 = arith.constant 0 : index
    %c0_9 = arith.constant 0 : index
    %19 = vector.load %arg6[%c0_6, %c0_7, %c0_8, %c0_9] : memref<1x1x1x1xf32, #tpu.memory_space<vmem>>, vector<1x1x1x1xf32>
    %20 = vector.shape_cast %19 : vector<1x1x1x1xf32> to vector<1x1xf32>
    %21 = vector.shape_cast %18 : vector<1x1xf32> to vector<1x1x1x1xf32>
    tpu.vector_store %arg6[%c0_6, %c0_7, %c0_8, %c0_9], %21 {strides = array<i32>} : memref<1x1x1x1xf32, #tpu.memory_space<vmem>>, vector<1x1x1x1xf32>,
    return
  }
  func.func @transform_0(%arg0: i32, %arg1: i32) -> i32 {
    %c0_i32 = arith.constant 0 : i32
    %c0_i32_0 = arith.constant 0 : i32
    return %c0_i32 : i32
  }
  func.func @transform_1(%arg0: i32, %arg1: i32) -> i32 {
    %c0_i32 = arith.constant 0 : i32
    %c0_i32_0 = arith.constant 0 : i32
    return %c0_i32 : i32
  }
  func.func @transform_2(%arg0: i32, %arg1: i32) -> (i32, i32, i32) {
    %c0_i32 = arith.constant 0 : i32
    %c0_i32_0 = arith.constant 0 : i32
    return %arg0, %arg1, %c0_i32 : i32, i32, i32
  }
  func.func @transform_3(%arg0: i32, %arg1: i32) -> (i32, i32, i32) {
    %c0_i32 = arith.constant 0 : i32
    %c0_i32_0 = arith.constant 0 : i32
    return %arg0, %arg1, %c0_i32 : i32, i32, i32
  }
  func.func @transform_4(%arg0: i32, %arg1: i32) -> (i32, i32, i32, i32) {
    %c0_i32 = arith.constant 0 : i32
    %c0_i32_0 = arith.constant 0 : i32
    %c0_i32_1 = arith.constant 0 : i32
    return %arg0, %arg1, %c0_i32, %c0_i32_0 : i32, i32, i32, i32
  }
}

</mosaic_0001>

<bundles_post_ra>
// kernel: tpu_custom_call.1
= control target key start
LH: loop header
LB: loop body
LE: loop exit
PB: predicated region body
PF: predicated region fallthrough
CT: control target
= control target key end

     0   :  { %9 = vsyncpa [#allocation3], 0  ;;  %s629_s0 = inlined_call_operand.hbm [shape: f32[3], index: 0, kind: input, shape index: {}]   ;;  %s630_s1 = inlined_call_operand.vmem [shape: f32[3], index: 1, kind: input, shape index: {}]   ;;  %s631_s2 = inlined_call_operand.vmem [shape: s8[3,4,128], index: 2, kind: input, shape index: {}]   ;;  %s632_s3 = inlined_call_operand.vmem [shape: s8[3,4,128], index: 3, kind: input, shape index: {}]   ;;  %s633_s4 = inlined_call_operand.vmem [shape: f32[3,1,1,1], index: 4, kind: output, shape index: {}]  }
   0x1   :  { %10 = vsyncpa [#allocation4], 0  ;;  %s539_s15 = smov 0   ;;  %s541_s16 = smov 0  }
   0x2   :  { %s543_s17 = smov 0  }
   0x3 LB: > { %s396_s18 = sadd.s32 4294967295, %s510_s17   ;;  %s28_s19 = sadd.s32 1, %s506_s16  ;;  %s510_s17 = sphi %s543_s17, %s16_s17   ;;  %s506_s16 = sphi %s541_s16, %s638_s16   ;;  %s502_s15 = sphi %s539_s15, %s637_s15  }
   0x4   : > { %p30_p0 = scmp.ge.s32.totalorder %s28_s19, 3  ;;  %p398_p1 = scmp.ge.s32.totalorder %s510_s17, 1 }
   0x5   : > { %p159_p2 = scmp.lt.s32.totalorder %s510_s17, 4  ;;  %p564_p4 = scmp.eq.s32.totalorder %s396_s18, 0 }
   0x6   : > { %s640_s19 = smov (%p30_p0, %s28_s19), 0  ;;  %s181_s24 = sshll.u32 %s630_s1, 4  ;;  %s182_s24 = int_to_ptr.vmem [resolvable:$true] %s181_s24 }
   0x7   : > { %p560_p3 = pnand %p398_p1, %p159_p2  ;;  %s452_s28 = scalar_lea.hbm %s629_s0, 16 }
   0x8   : > { %p453_p7 = scmp.ne.s32.totalorder %s629_s0, %s452_s28  ;;  %p459_p11 = scmp.lt.u32.totalorder %s452_s28, %s629_s0 }
   0x9   : > { %p415_p5 = pneg %p560_p3 }
   0xb   : > { %p575_p6 = pnand %p564_p4, %p415_p5 }
   0xd   : > { %p454_p8 = pneg %p575_p6 }
   0xf   : > { %p455_p9 = pnand %p454_p8, %p453_p7 }
  0x11   : > { %p456_p10 = pneg %p455_p9 }
  0x13   : > { %p461_p12 = pnand %p459_p11, %p456_p10 }
  0x15   : > { %464 = shalt.err (!%p461_p12)
}
  0x16   : > { %s512_s7 = smov [#allocation2]   ;;  %s465_s10 = scalar_lea.vmem %s182_s24, 16 }
  0x17   : > { %418 = dma.hbm_to_smem (!%p575_p6), %s629_s0, 16, %s512_s7, [#allocation3]  }
  0x18   : > { %p466_p13 = scmp.ne.s32.totalorder %s182_s24, %s465_s10  ;;  %p473_p2 = scmp.lt.s32.totalorder %s182_s24, %s182_s24 }
  0x19   : > { %p474_p5 = scmp.lt.s32.totalorder %s465_s10, %s465_s10 }
  0x1a   : > { %p468_p0 = pnand %p466_p13, %p454_p8 }
  0x1b   : > { %p475_p7 = por %p474_p5, %p473_p2 }
  0x1c   : > { %p469_p1 = pneg %p468_p0 }
  0x1e   : > { %p476_p9 = pnand %p475_p7, %p469_p1 }
  0x20   : > { %479 = shalt.err (!%p476_p9)
}
  0x21   : > { %s513_s11 = smov [#allocation5]   ;;  %212 = sbr.rel (%p560_p3) target bundleno = 215 (0xd7), region = 36 }
  0x22   : > { %421 = dma.vmem_to_smem (!%p575_p6), %s182_s24, 16, %s513_s11, [#allocation4]  }
  0x28   : > { %493 = dma.done.wait (%p564_p4), [#allocation3], 16  }
  0x29   : > { %495 = vsyncadd (%p564_p4), [#allocation3], 4294967280 }
  0x2a   : > { %497 = dma.done.wait (%p564_p4), [#allocation4], 16  }
  0x2b   : > { %499 = vsyncadd (%p564_p4), [#allocation4], 4294967280 }
  0x2c   : > { %222 = sfence }
  0x2d   : > { %p251_p6 = scmp.lt.s32.totalorder %s502_s15, 2  ;;  %s275_s12 = sld [smem:[#allocation2 + %s502_s15]]  ;;  %vm282_vm0 = vcmask 1043456   ;;  %vm292_vm1 = vcmask 0  }
  0x2e   : > { %s278_s13 = sld [smem:[#allocation5 + %s502_s15]] }
  0x2f   : > { %s642_s15 = smov (!%p251_p6, %s502_s15), 2 }
  0x30   : > { %s256_s20 = scalar_lea.vmem %s631_s2, %s642_s15  ;;  %s262_s24 = scalar_lea.vmem %s632_s3, %s642_s15 }
  0x31   : > { %v269_v0 = vld [vmem:[%s256_s20] sm:$0x1]  ;;  %s268_s26 = scalar_lea.vmem %s633_s4, %s642_s15 }
  0x32   : > { %v272_v1 = vld [vmem:[%s262_s24] sm:$0x1]  ;;  %v270_v2 = vunpack.c.0.s8 %v269_v0 }
  0x33   : > { %v273_v3 = vunpack.c.0.s8 %v272_v1  ;;  %v276_v4 = vstv %s275_s12 }
  0x34   : > { %v279_v5 = vstv %s278_s13  ;;  %v271_v6 = vcvt.s32.f32 %v270_v2 }
  0x35   : > { %v274_v7 = vcvt.s32.f32 %v273_v3 }
  0x36   : > { %v277_v8 = vmul.f32 %v276_v4, %v271_v6 }
  0x37   : > { %v280_v9 = vmul.f32 %v279_v5, %v274_v7 }
  0x39   : > { %v281_v10 = vadd.f32 %v280_v9, %v277_v8 }
  0x3b   : > { %v283_v11 = vsel %vm282_vm0, %v281_v10, 0.0 }
  0x3c   : > { %v284_v12 = vrot.slane %v283_v11, 4 }
  0x3e   : > { %v285_v13 = vadd.f32 %v284_v12, %v283_v11 }
  0x40   : > { %v286_v14 = vrot.slane %v285_v13, 2 }
  0x42   : > { %v287_v15 = vadd.f32 %v286_v14, %v285_v13 }
  0x44   : > { %v288_v16 = vrot.slane %v287_v15, 1 }
  0x46   : > { %v289_v17 = vadd.f32 %v288_v16, %v287_v15 }
  0x48   : > { %290 = vadd.xlane.f32.xlu0 %v289_v17 }
  0xd5   : > { %v291_v18 = vpop.xlane.xlu0 %290 }
  0xd6   : > { %293 = vst.msk [vmem:[%s268_s26] sm:$0x1] %vm292_vm1, %v291_v18 }
  0xd7 PF: > { %s16_s17 = sadd.s32 1, %s510_s17   ;;  %s637_s15 = smov %s506_s16 }
  0xd8   : > { %p13_p3 = scmp.ge.s32.totalorder %s16_s17, 5   ;;  %s638_s16 = smov %s640_s19 }
  0xda   :  { %15 = sbr.rel (!%p13_p3) target bundleno = 3 (0x3), region = 79 }
  0xe1   :  { %317 = vsyncpa [#allocation3], 1 }
  0xe2   :  { %319 = vsyncpa [#allocation3 + $0x1], 1 }
  0xe3   :  { %320 = vsyncpa [#allocation4], 1 }
  0xe4   :  { %322 = vsyncpa [#allocation4 + $0x1], 1 }

</bundles_post_ra>
